<compile_context>
chip_gen: v5e
topology: v5e:2x2
jax: 0.10.0
libtpu: 0.0.40
codegen_flags: <defaults>
</compile_context>

<pallas_src>
import jax
import jax.numpy as jnp
from jax.experimental import pallas as pl
from jax.experimental.pallas import tpu as pltpu

# Synthetic dimension constants (the original repo defines these elsewhere).
TRAIN_VECTOR_DIMS = 16
STATION_VECTOR_DIMS = 16
PREDICTION_VECTOR_DIMS = 32
IN_DIMS = TRAIN_VECTOR_DIMS + STATION_VECTOR_DIMS

LEAKY_SLOPE = 0.01              # nn.LeakyReLU default negative_slope
_LANE = 128
_PACK = 8                       # batch rows packed per VMEM row (8 * 16 feats = 128 lanes)
_MIN_SPLIT = 1024               # only force a 2-tile grid (v7x megacore) above 2*this rows
DEFAULT_TILE_B_MAX = 16384      # rows per grid step (review: 8K-16K amortizes ~0.35us/step)

assert (_PACK * TRAIN_VECTOR_DIMS) % _LANE == 0
assert (_PACK * STATION_VECTOR_DIMS) % _LANE == 0
assert (_PACK * PREDICTION_VECTOR_DIMS) % _LANE == 0


def _round_up(x, m):
    return (x + m - 1) // m * m


def _cdiv(a, b):
    return -(-a // b)


def _predict_init_kernel(xt_ref, xs_ref, w1t_ref, w1s_ref, b1_ref,
                         w2_ref, b2_ref, w3_ref, b3_ref, out_ref):
    """Batch-packed layout: every activation is (tile_b/8, 8*features), fully lane-dense.

    Matmul operands are cast to bf16 (single-pass native MXU on v5e/v6e/v7x) with f32
    accumulation; bias add / LeakyReLU (VPU) and sigmoid (EUP) stay in f32."""
    mxu = jnp.bfloat16
    xt = xt_ref[...].astype(mxu)            # (t8, 128): 8 batch rows x 16 train feats
    xs = xs_ref[...].astype(mxu)            # (t8, 128): 8 batch rows x 16 station feats

    # Layer 1: concat(train, station) @ W1^T done as two matmuls against the pre-split,
    # block-diagonalised halves of W1 -> no concatenate in the kernel or the wrapper.
    h = (jnp.dot(xt, w1t_ref[...], preferred_element_type=jnp.float32)
         + jnp.dot(xs, w1s_ref[...], preferred_element_type=jnp.float32)
         + b1_ref[...])                      # (t8, 256) f32
    h = jnp.maximum(h, LEAKY_SLOPE * h)      # exact LeakyReLU since 0 < slope < 1

    # Layer 2: Linear + LeakyReLU
    h = jnp.dot(h.astype(mxu), w2_ref[...], preferred_element_type=jnp.float32) + b2_ref[...]
    h = jnp.maximum(h, LEAKY_SLOPE * h)

    # Layer 3: Linear + Sigmoid (EUP slot — free next to MXU/VPU/DMA)
    h = jnp.dot(h.astype(mxu), w3_ref[...], preferred_element_type=jnp.float32) + b3_ref[...]
    out_ref[...] = jax.nn.sigmoid(h).astype(out_ref.dtype)


def _pack_params(params, mxu_dtype=jnp.bfloat16):
    """PyTorch-layout params -> packed kernel params.

    Each weight (out, in) becomes kron(I_8, W^T): a block-diagonal (8*in, 8*out) matrix
    so the batch-packed activations flow through plain matmuls; biases are tiled 8x
    along lanes.  A few hundred KB of one-off work (pre-compute it once in production)."""
    (w1, b1), (w2, b2), (w3, b3) = params
    eye = jnp.eye(_PACK, dtype=jnp.float32)

    def block_diag(w):                      # (out, in) -> (8*in, 8*out)
        return jnp.kron(eye, w.astype(jnp.float32).T).astype(mxu_dtype)

    def pack_bias(b):                       # (out,) or (out,1) -> (1, 8*out) f32
        return jnp.tile(b.astype(jnp.float32).reshape(-1), _PACK).reshape(1, -1)

    w1t = w1[:, :TRAIN_VECTOR_DIMS]         # train half of the first layer
    w1s = w1[:, TRAIN_VECTOR_DIMS:]         # station half
    return (block_diag(w1t), block_diag(w1s), pack_bias(b1),
            block_diag(w2), pack_bias(b2),
            block_diag(w3), pack_bias(b3))


def predict_init_forward(train, station, params, tile_b_max=DEFAULT_TILE_B_MAX):
    """train: (B, TRAIN_VECTOR_DIMS), station: (B, STATION_VECTOR_DIMS)
       -> (B, PREDICTION_VECTOR_DIMS), dtype follows the inputs (f32 or bf16)."""
    assert train.shape[1] == TRAIN_VECTOR_DIMS and station.shape[1] == STATION_VECTOR_DIMS
    assert train.shape[0] == station.shape[0]
    batch = train.shape[0]
    out_dtype = train.dtype
    station = station.astype(train.dtype)

    w1t, w1s, b1p, w2p, b2p, w3p, b3p = _pack_params(params)

    # Adaptive tiling: big tiles amortize per-step overhead; cap tile size so padding
    # waste stays small, and force >= 2 tiles for large batches so both v7x TCs work.
    tile_b_max = max(_LANE, _round_up(tile_b_max, _LANE))
    padded128 = _round_up(max(batch, 1), _LANE)
    n_tiles = _cdiv(padded128, tile_b_max)
    if n_tiles < 2 and padded128 >= 2 * _MIN_SPLIT:
        n_tiles = 2
    tile_b = _round_up(_cdiv(padded128, n_tiles), _LANE)
    padded = n_tiles * tile_b

    if padded != batch:
        train = jnp.pad(train, ((0, padded - batch), (0, 0)))
        station = jnp.pad(station, ((0, padded - batch), (0, 0)))

    # Free (bitcast) reshapes: pack 8 consecutive batch rows per VMEM row so every
    # streamed block is lane-dense.  No concat / transpose / extra HBM pass anywhere.
    xt = train.reshape(padded // _PACK, _PACK * TRAIN_VECTOR_DIMS)      # (B/8, 128)
    xs = station.reshape(padded // _PACK, _PACK * STATION_VECTOR_DIMS)  # (B/8, 128)

    t8 = tile_b // _PACK
    in_lanes_t = _PACK * TRAIN_VECTOR_DIMS
    in_lanes_s = _PACK * STATION_VECTOR_DIMS
    out_lanes = _PACK * PREDICTION_VECTOR_DIMS

    cost = pl.CostEstimate(
        flops=2 * padded * PREDICTION_VECTOR_DIMS * (IN_DIMS + 2 * PREDICTION_VECTOR_DIMS),
        transcendentals=padded * PREDICTION_VECTOR_DIMS,
        bytes_accessed=(padded * IN_DIMS * train.dtype.itemsize
                        + padded * PREDICTION_VECTOR_DIMS * jnp.dtype(out_dtype).itemsize
                        + sum(int(a.size) * a.dtype.itemsize
                              for a in (w1t, w1s, b1p, w2p, b2p, w3p, b3p))),
    )

    resident = lambda i: (0, 0)   # weights/biases: constant index_map -> VMEM-resident

    out_packed = pl.pallas_call(
        _predict_init_kernel,
        out_shape=jax.ShapeDtypeStruct((padded // _PACK, out_lanes), out_dtype),
        grid=(n_tiles,),
        in_specs=[
            # Streamed, batch-packed activations: one lane-dense block per grid step.
            # (Optional sweep: pipeline_mode=pl.Buffered(3) on these + out_specs.)
            pl.BlockSpec((t8, in_lanes_t), lambda i: (i, 0)),
            pl.BlockSpec((t8, in_lanes_s), lambda i: (i, 0)),
            # Resident weights / biases.
            pl.BlockSpec(w1t.shape, resident),
            pl.BlockSpec(w1s.shape, resident),
            pl.BlockSpec(b1p.shape, resident),
            pl.BlockSpec(w2p.shape, resident),
            pl.BlockSpec(b2p.shape, resident),
            pl.BlockSpec(w3p.shape, resident),
            pl.BlockSpec(b3p.shape, resident),
        ],
        out_specs=pl.BlockSpec((t8, out_lanes), lambda i: (i, 0)),
        compiler_params=pltpu.CompilerParams(
            dimension_semantics=("parallel",),
            # ~9 MiB at the default tile; 40 MiB leaves headroom for larger tiles while
            # staying well under v7x's 64 MiB/TC physical VMEM.
            vmem_limit_bytes=40 * 1024 * 1024,
        ),
        cost_estimate=cost,
    )(xt, xs, w1t, w1s, b1p, w2p, b2p, w3p, b3p)

    # Free bitcast back to (padded, 32); drop batch padding.
    return out_packed.reshape(padded, PREDICTION_VECTOR_DIMS)[:batch]


def init_params(key):
    """Deterministic synthetic parameters matching nn.Linear shapes:
       weights (out_features, in_features), biases (out_features,)."""
    dims = [(PREDICTION_VECTOR_DIMS, IN_DIMS),
            (PREDICTION_VECTOR_DIMS, PREDICTION_VECTOR_DIMS),
            (PREDICTION_VECTOR_DIMS, PREDICTION_VECTOR_DIMS)]
    params = []
    for fan_out, fan_in in dims:
        key, kw, kb = jax.random.split(key, 3)
        bound = 1.0 / float(fan_in) ** 0.5    # PyTorch default U(-1/sqrt(fan_in), +)
        w = jax.random.uniform(kw, (fan_out, fan_in), jnp.float32, -bound, bound)
        b = jax.random.uniform(kb, (fan_out,), jnp.float32, -bound, bound)
        params.append((w, b))
    return params


def _reference(train, station, params):
    x = jnp.concatenate([train.astype(jnp.float32), station.astype(jnp.float32)], axis=1)
    for i, (w, b) in enumerate(params):
        x = x @ w.astype(jnp.float32).T + b.astype(jnp.float32)
        if i < 2:
            x = jnp.where(x >= 0, x, LEAKY_SLOPE * x)
        else:
            x = jax.nn.sigmoid(x)
    return x


if __name__ == "__main__":
    key = jax.random.PRNGKey(0)
    kp, k1, k2, k3, k4, k5, k6 = jax.random.split(key, 7)
    params = init_params(kp)

    # 1) Small smoke test: batch=8 (padded to one 128-row tile).
    train = jax.random.normal(k1, (8, TRAIN_VECTOR_DIMS), jnp.float32)
    station = jax.random.normal(k2, (8, STATION_VECTOR_DIMS), jnp.float32)
    out = predict_init_forward(train, station, params)
    jax.block_until_ready(out)
    assert out.shape == (8, PREDICTION_VECTOR_DIMS)
    err = float(jnp.max(jnp.abs(out - _reference(train, station, params))))
    # bf16 MXU operands -> loosened tolerance (review's precision note).
    assert err < 2e-2, f"mismatch (batch=8): {err}"

    # 2) Multi-tile grid + adaptive padding: batch=300 with tile cap 128 -> grid of 3.
    train2 = jax.random.normal(k3, (300, TRAIN_VECTOR_DIMS), jnp.float32)
    station2 = jax.random.normal(k4, (300, STATION_VECTOR_DIMS), jnp.float32)
    out2 = predict_init_forward(train2, station2, params, tile_b_max=128)
    jax.block_until_ready(out2)
    assert out2.shape == (300, PREDICTION_VECTOR_DIMS)
    err2 = float(jnp.max(jnp.abs(out2 - _reference(train2, station2, params))))
    assert err2 < 2e-2, f"mismatch (batch=300): {err2}"

    # 3) bf16 streaming I/O (halves HBM traffic when the caller already holds bf16).
    train3 = jax.random.normal(k5, (200, TRAIN_VECTOR_DIMS), jnp.float32).astype(jnp.bfloat16)
    station3 = jax.random.normal(k6, (200, STATION_VECTOR_DIMS), jnp.float32).astype(jnp.bfloat16)
    out3 = predict_init_forward(train3, station3, params)
    jax.block_until_ready(out3)
    assert out3.shape == (200, PREDICTION_VECTOR_DIMS)
    assert out3.dtype == jnp.bfloat16
    err3 = float(jnp.max(jnp.abs(out3.astype(jnp.float32)
                                 - _reference(train3, station3, params))))
    assert err3 < 4e-2, f"mismatch (bf16): {err3}"

    print("KERNEL_OK")
</pallas_src>

<mosaic_0001>
module attributes {stable_mosaic.version = 11 : i64} {
  func.func @_predict_init_kernel(%arg0: i32, %arg1: memref<16x128xf32, #tpu.memory_space<vmem>>, %arg2: memref<16x128xf32, #tpu.memory_space<vmem>>, %arg3: memref<128x256xbf16, #tpu.memory_space<vmem>>, %arg4: memref<128x256xbf16, #tpu.memory_space<vmem>>, %arg5: memref<1x256xf32, #tpu.memory_space<vmem>>, %arg6: memref<256x256xbf16, #tpu.memory_space<vmem>>, %arg7: memref<1x256xf32, #tpu.memory_space<vmem>>, %arg8: memref<256x256xbf16, #tpu.memory_space<vmem>>, %arg9: memref<1x256xf32, #tpu.memory_space<vmem>>, %arg10: memref<16x256xf32, #tpu.memory_space<vmem>>) attributes {dimension_semantics = [#tpu.dimension_semantics<parallel>], iteration_bounds = array<i64: 1>, scalar_prefetch = 0 : i64, scratch_operands = 0 : i64, tpu.core_type = #tpu.core_type<tc>, window_params = [{transform_indices = @transform_0, window_bounds = array<i64: 16, 128>}, {transform_indices = @transform_1, window_bounds = array<i64: 16, 128>}, {pipeline_mode = #tpu.pipeline_mode<synchronous>, transform_indices = @transform_2, window_bounds = array<i64: 128, 256>}, {pipeline_mode = #tpu.pipeline_mode<synchronous>, transform_indices = @transform_3, window_bounds = array<i64: 128, 256>}, {pipeline_mode = #tpu.pipeline_mode<synchronous>, transform_indices = @transform_4, window_bounds = array<i64: 1, 256>}, {pipeline_mode = #tpu.pipeline_mode<synchronous>, transform_indices = @transform_5, window_bounds = array<i64: 256, 256>}, {pipeline_mode = #tpu.pipeline_mode<synchronous>, transform_indices = @transform_6, window_bounds = array<i64: 1, 256>}, {pipeline_mode = #tpu.pipeline_mode<synchronous>, transform_indices = @transform_7, window_bounds = array<i64: 256, 256>}, {pipeline_mode = #tpu.pipeline_mode<synchronous>, transform_indices = @transform_8, window_bounds = array<i64: 1, 256>}, {transform_indices = @transform_9, window_bounds = array<i64: 16, 256>}]} {
    %c0 = arith.constant 0 : index
    %c0_0 = arith.constant 0 : index
    %0 = vector.load %arg1[%c0, %c0_0] : memref<16x128xf32, #tpu.memory_space<vmem>>, vector<16x128xf32>
    %1 = arith.truncf %0 : vector<16x128xf32> to vector<16x128xbf16>
    %c0_1 = arith.constant 0 : index
    %c0_2 = arith.constant 0 : index
    %2 = vector.load %arg2[%c0_1, %c0_2] : memref<16x128xf32, #tpu.memory_space<vmem>>, vector<16x128xf32>
    %3 = arith.truncf %2 : vector<16x128xf32> to vector<16x128xbf16>
    %c0_3 = arith.constant 0 : index
    %c0_4 = arith.constant 0 : index
    %4 = vector.load %arg3[%c0_3, %c0_4] : memref<128x256xbf16, #tpu.memory_space<vmem>>, vector<128x256xbf16>
    %cst = arith.constant dense<0.000000e+00> : vector<16x256xf32>
    %5 = tpu.matmul %1, %4, %cst {dimension_numbers = #tpu.dot_dimension_numbers<[1], [0], [0], [1], [0, 0, 1, 1], [], []>} : vector<16x128xbf16>, vector<128x256xbf16>, vector<16x256xf32> -> vector<16x256xf32>
    %c0_5 = arith.constant 0 : index
    %c0_6 = arith.constant 0 : index
    %6 = vector.load %arg4[%c0_5, %c0_6] : memref<128x256xbf16, #tpu.memory_space<vmem>>, vector<128x256xbf16>
    %cst_7 = arith.constant dense<0.000000e+00> : vector<16x256xf32>
    %7 = tpu.matmul %3, %6, %cst_7 {dimension_numbers = #tpu.dot_dimension_numbers<[1], [0], [0], [1], [0, 0, 1, 1], [], []>} : vector<16x128xbf16>, vector<128x256xbf16>, vector<16x256xf32> -> vector<16x256xf32>
    %8 = arith.addf %5, %7 : vector<16x256xf32>
    %c0_8 = arith.constant 0 : index
    %c0_9 = arith.constant 0 : index
    %9 = vector.load %arg5[%c0_8, %c0_9] : memref<1x256xf32, #tpu.memory_space<vmem>>, vector<1x256xf32>
    %10 = vector.broadcast %9 : vector<1x256xf32> to vector<16x256xf32>
    %11 = arith.addf %8, %10 : vector<16x256xf32>
    %cst_10 = arith.constant 0.00999999977 : f32
    %12 = vector.broadcast %cst_10 : f32 to vector<16x256xf32>
    %13 = arith.mulf %12, %11 : vector<16x256xf32>
    %14 = arith.maximumf %11, %13 : vector<16x256xf32>
    %15 = arith.truncf %14 : vector<16x256xf32> to vector<16x256xbf16>
    %c0_11 = arith.constant 0 : index
    %c0_12 = arith.constant 0 : index
    %16 = vector.load %arg6[%c0_11, %c0_12] : memref<256x256xbf16, #tpu.memory_space<vmem>>, vector<256x256xbf16>
    %cst_13 = arith.constant dense<0.000000e+00> : vector<16x256xf32>
    %17 = tpu.matmul %15, %16, %cst_13 {dimension_numbers = #tpu.dot_dimension_numbers<[1], [0], [0], [1], [0, 0, 1, 1], [], []>} : vector<16x256xbf16>, vector<256x256xbf16>, vector<16x256xf32> -> vector<16x256xf32>
    %c0_14 = arith.constant 0 : index
    %c0_15 = arith.constant 0 : index
    %18 = vector.load %arg7[%c0_14, %c0_15] : memref<1x256xf32, #tpu.memory_space<vmem>>, vector<1x256xf32>
    %19 = vector.broadcast %18 : vector<1x256xf32> to vector<16x256xf32>
    %20 = arith.addf %17, %19 : vector<16x256xf32>
    %cst_16 = arith.constant 0.00999999977 : f32
    %21 = vector.broadcast %cst_16 : f32 to vector<16x256xf32>
    %22 = arith.mulf %21, %20 : vector<16x256xf32>
    %23 = arith.maximumf %20, %22 : vector<16x256xf32>
    %24 = arith.truncf %23 : vector<16x256xf32> to vector<16x256xbf16>
    %c0_17 = arith.constant 0 : index
    %c0_18 = arith.constant 0 : index
    %25 = vector.load %arg8[%c0_17, %c0_18] : memref<256x256xbf16, #tpu.memory_space<vmem>>, vector<256x256xbf16>
    %cst_19 = arith.constant dense<0.000000e+00> : vector<16x256xf32>
    %26 = tpu.matmul %24, %25, %cst_19 {dimension_numbers = #tpu.dot_dimension_numbers<[1], [0], [0], [1], [0, 0, 1, 1], [], []>} : vector<16x256xbf16>, vector<256x256xbf16>, vector<16x256xf32> -> vector<16x256xf32>
    %c0_20 = arith.constant 0 : index
    %c0_21 = arith.constant 0 : index
    %27 = vector.load %arg9[%c0_20, %c0_21] : memref<1x256xf32, #tpu.memory_space<vmem>>, vector<1x256xf32>
    %28 = vector.broadcast %27 : vector<1x256xf32> to vector<16x256xf32>
    %29 = arith.addf %26, %28 : vector<16x256xf32>
    %30 = arith.negf %29 : vector<16x256xf32>
    %31 = math.exp %30 : vector<16x256xf32>
    %cst_22 = arith.constant 1.000000e+00 : f32
    %32 = vector.broadcast %cst_22 : f32 to vector<16x256xf32>
    %33 = arith.addf %32, %31 : vector<16x256xf32>
    %34 = arith.divf %32, %33 : vector<16x256xf32>
    %c0_23 = arith.constant 0 : index
    %c0_24 = arith.constant 0 : index
    %35 = vector.load %arg10[%c0_23, %c0_24] : memref<16x256xf32, #tpu.memory_space<vmem>>, vector<16x256xf32>
    tpu.vector_store %arg10[%c0_23, %c0_24], %34 {strides = array<i32>} : memref<16x256xf32, #tpu.memory_space<vmem>>, vector<16x256xf32>,
    return
  }
  func.func @transform_0(%arg0: i32) -> (i32, i32) {
    %c0_i32 = arith.constant 0 : i32
    %c0_i32_0 = arith.constant 0 : i32
    return %arg0, %c0_i32 : i32, i32
  }
  func.func @transform_1(%arg0: i32) -> (i32, i32) {
    %c0_i32 = arith.constant 0 : i32
    %c0_i32_0 = arith.constant 0 : i32
    return %arg0, %c0_i32 : i32, i32
  }
  func.func @transform_2(%arg0: i32) -> (i32, i32) {
    %c0_i32 = arith.constant 0 : i32
    %c0_i32_0 = arith.constant 0 : i32
    %c0_i32_1 = arith.constant 0 : i32
    return %c0_i32, %c0_i32_0 : i32, i32
  }
  func.func @transform_3(%arg0: i32) -> (i32, i32) {
    %c0_i32 = arith.constant 0 : i32
    %c0_i32_0 = arith.constant 0 : i32
    %c0_i32_1 = arith.constant 0 : i32
    return %c0_i32, %c0_i32_0 : i32, i32
  }
  func.func @transform_4(%arg0: i32) -> (i32, i32) {
    %c0_i32 = arith.constant 0 : i32
    %c0_i32_0 = arith.constant 0 : i32
    %c0_i32_1 = arith.constant 0 : i32
    return %c0_i32, %c0_i32_0 : i32, i32
  }
  func.func @transform_5(%arg0: i32) -> (i32, i32) {
    %c0_i32 = arith.constant 0 : i32
    %c0_i32_0 = arith.constant 0 : i32
    %c0_i32_1 = arith.constant 0 : i32
    return %c0_i32, %c0_i32_0 : i32, i32
  }
  func.func @transform_6(%arg0: i32) -> (i32, i32) {
    %c0_i32 = arith.constant 0 : i32
    %c0_i32_0 = arith.constant 0 : i32
    %c0_i32_1 = arith.constant 0 : i32
    return %c0_i32, %c0_i32_0 : i32, i32
  }
  func.func @transform_7(%arg0: i32) -> (i32, i32) {
    %c0_i32 = arith.constant 0 : i32
    %c0_i32_0 = arith.constant 0 : i32
    %c0_i32_1 = arith.constant 0 : i32
    return %c0_i32, %c0_i32_0 : i32, i32
  }
  func.func @transform_8(%arg0: i32) -> (i32, i32) {
    %c0_i32 = arith.constant 0 : i32
    %c0_i32_0 = arith.constant 0 : i32
    %c0_i32_1 = arith.constant 0 : i32
    return %c0_i32, %c0_i32_0 : i32, i32
  }
  func.func @transform_9(%arg0: i32) -> (i32, i32) {
    %c0_i32 = arith.constant 0 : i32
    %c0_i32_0 = arith.constant 0 : i32
    return %arg0, %c0_i32 : i32, i32
  }
}

</mosaic_0001>

<bundles_post_ra>
// kernel: tpu_custom_call.1
= control target key start
LH: loop header
LB: loop body
LE: loop exit
PB: predicated region body
PF: predicated region fallthrough
CT: control target
= control target key end

     0   :  { %14 = vsyncpa [#allocation3], 0  ;;  %s1819_s0 = inlined_call_operand.hbm [shape: f32[16,128], index: 0, kind: input, shape index: {}]   ;;  %s1820_s1 = inlined_call_operand.hbm [shape: f32[16,128], index: 1, kind: input, shape index: {}]   ;;  %s1821_s2 = inlined_call_operand.hbm [shape: bf16[128,256], index: 2, kind: input, shape index: {}]   ;;  %s1822_s3 = inlined_call_operand.hbm [shape: bf16[128,256], index: 3, kind: input, shape index: {}]   ;;  %s1823_s4 = inlined_call_operand.vmem [shape: f32[1,256], index: 4, kind: input, shape index: {}]   ;;  %s1824_s5 = inlined_call_operand.hbm [shape: bf16[256,256], index: 5, kind: input, shape index: {}]   ;;  %s1825_s6 = inlined_call_operand.vmem [shape: f32[1,256], index: 6, kind: input, shape index: {}]   ;;  %s1826_s7 = inlined_call_operand.hbm [shape: bf16[256,256], index: 7, kind: input, shape index: {}]   ;;  %s1827_s8 = inlined_call_operand.vmem [shape: f32[1,256], index: 8, kind: input, shape index: {}]   ;;  %s1828_s9 = inlined_call_operand.hbm [shape: f32[16,256], index: 9, kind: output, shape index: {}]  }
   0x1   :  { %15 = vsyncpa [#allocation6], 0 }
   0x2   :  { %16 = vsyncpa [#allocation9], 0 }
   0x3   :  { %17 = vsyncpa [#allocation12], 0 }
   0x4   :  { %18 = vsyncpa [#allocation4], 0  ;;  %s36_s11 = sshll.u32 %s1820_s1, 4  ;;  %s1710_s12 = smov [#allocation5]   ;;  %s37_s11 = int_to_ptr.hbm [resolvable:$true] %s36_s11 }
   0x5   :  { %s38_s13 = sshll.u32 %s1710_s12, 4  ;;  %s62_s16 = sshll.u32 %s1822_s3, 4  ;;  %s39_s13 = int_to_ptr.vmem [resolvable:$true] %s38_s13  ;;  %s63_s16 = int_to_ptr.hbm [resolvable:$true] %s62_s16 }
   0x6   :  { %s1711_s17 = smov 128   ;;  %s1712_s18 = smov 8  }
   0x7   :  { %44 = dma.hbm_to_vmem [thread:$0]  %s37_s11, 256, %s39_s13, [#allocation6], %s1711_s17, %s1711_s17, %s1712_s18  }
   0x8   :  { %s1713_s19 = smov [#allocation8]   ;;  %s23_s1 = sshll.u32 %s1819_s0, 4  ;;  %s24_s1 = int_to_ptr.hbm [resolvable:$true] %s23_s1 }
   0x9   :  { %s64_s20 = sshll.u32 %s1713_s19, 4  ;;  %s49_s24 = sshll.u32 %s1821_s2, 4  ;;  %s65_s20 = int_to_ptr.vmem [resolvable:$true] %s64_s20  ;;  %s50_s24 = int_to_ptr.hbm [resolvable:$true] %s49_s24 }
   0xa   :  { %70 = dma.hbm_to_vmem [thread:$0]  %s63_s16, 2048, %s65_s20, [#allocation9], %s1711_s17, %s1711_s17, %s1712_s18  }
   0xb   :  { %s1714_s25 = smov [#allocation2]   ;;  %s1715_s27 = smov [#allocation7]  }
   0xc   :  { %s25_s26 = sshll.u32 %s1714_s25, 4  ;;  %s51_s0 = sshll.u32 %s1715_s27, 4  ;;  %s26_s26 = int_to_ptr.vmem [resolvable:$true] %s25_s26  ;;  %s52_s0 = int_to_ptr.vmem [resolvable:$true] %s51_s0 }
   0xd   :  { %31 = dma.hbm_to_vmem [thread:$0]  %s24_s1, 256, %s26_s26, [#allocation3], %s1711_s17, %s1711_s17, %s1712_s18  }
   0xe   :  { %s77_s30 = sshll.u32 %s1824_s5, 4  ;;  %s92_s11 = sshll.u32 %s1826_s7, 4  ;;  %s78_s30 = int_to_ptr.hbm [resolvable:$true] %s77_s30  ;;  %s93_s11 = int_to_ptr.hbm [resolvable:$true] %s92_s11 }
   0xf   :  { %57 = dma.hbm_to_vmem [thread:$0]  %s50_s24, 2048, %s52_s0, [#allocation6], %s1711_s17, %s1711_s17, %s1712_s18  }
  0x10   :  { %s1716_s12 = smov [#allocation10]   ;;  %s1717_s14 = smov [#allocation11]  }
  0x11   :  { %s79_s13 = sshll.u32 %s1716_s12, 4  ;;  %s94_s5 = sshll.u32 %s1717_s14, 4  ;;  %s80_s13 = int_to_ptr.vmem [resolvable:$true] %s79_s13  ;;  %s95_s5 = int_to_ptr.vmem [resolvable:$true] %s94_s5 }
  0x12   :  { %85 = dma.hbm_to_vmem [thread:$0]  %s78_s30, 4096, %s80_s13, [#allocation9], %s1711_s17, %s1711_s17, %s1712_s18  }
  0x13   :  { %100 = dma.hbm_to_vmem [thread:$0]  %s93_s11, 4096, %s95_s5, [#allocation12], %s1711_s17, %s1711_s17, %s1712_s18  }
  0x14   :  { %1700 = dma.done.wait [#allocation3], 256  }
  0x15   :  { %1701 = vsyncadd [#allocation3], 4294967040 }
  0x16   :  { %1702 = dma.done.wait [#allocation6], 2304  }
  0x17   :  { %1703 = vsyncadd [#allocation6], 4294964992 }
  0x18   :  { %1704 = dma.done.wait [#allocation9], 6144  }
  0x19   :  { %1705 = vsyncadd [#allocation9], 4294961152 }
  0x1a   :  { %1706 = dma.done.wait [#allocation12], 4096  }
  0x1b   :  { %1707 = vsyncadd [#allocation12], 4294963200  ;;  %v1079_v0 = vld [vmem:[#allocation8 + $0x70] sm:$0xf]  ;;  %v1440_v1 = vld [vmem:[#allocation8 + $0x74] sm:$0xf0] }
  0x1c   :  { %v1439_v2 = vld [vmem:[#allocation8 + $0x74] sm:$0xf]  ;;  %v1080_v3 = vor.u32 %v1440_v1, %v1079_v0  ;;  %v1081_v4 = vld [vmem:[#allocation8 + $0x78] sm:$0xf0]  ;;  %v1143_v5 = vld [vmem:[#allocation7 + $0x70] sm:$0xf] }
  0x1d   :  { %v1424_v6 = vld [vmem:[#allocation7 + $0x74] sm:$0xf0]  ;;  %v1084_v7 = vor.u32 %v1439_v2, %v1081_v4  ;;  %v1423_v9 = vld [vmem:[#allocation7 + $0x74] sm:$0xf]  ;;  %v1145_v10 = vld [vmem:[#allocation7 + $0x78] sm:$0xf0] }
  0x1e   :  { %v1144_v8 = vor.u32 %v1424_v6, %v1143_v5  ;;  %v1071_v11 = vld [vmem:[#allocation8 + $0x60] sm:$0xf]  ;;  %245 = vmatpush.bf16.msra.mxu0 %v1080_v3  ;;  %v1148_v12 = vor.u32 %v1423_v9, %v1145_v10  ;;  %v1438_v13 = vld [vmem:[#allocation8 + $0x64] sm:$0xf0]  ;;  %v1437_v14 = vld [vmem:[#allocation8 + $0x64] sm:$0xf] }
  0x1f   :  { %v1073_v15 = vld [vmem:[#allocation8 + $0x68] sm:$0xf0]  ;;  %259 = vmatpush.bf16.msra.mxu1 %v1084_v7  ;;  %v1072_v16 = vor.u32 %v1438_v13, %v1071_v11  ;;  %v1135_v18 = vld [vmem:[#allocation7 + $0x60] sm:$0xf]  ;;  %v1422_v19 = vld [vmem:[#allocation7 + $0x64] sm:$0xf0] }
  0x20   :  { %353 = vmatpush.bf16.msra.mxu2 %v1144_v8  ;;  %v1076_v17 = vor.u32 %v1437_v14, %v1073_v15  ;;  %v1421_v20 = vld [vmem:[#allocation7 + $0x64] sm:$0xf]  ;;  %367 = vmatpush.bf16.msra.mxu3 %v1148_v12  ;;  %v1136_v21 = vor.u32 %v1422_v19, %v1135_v18  ;;  %v1137_v22 = vld [vmem:[#allocation7 + $0x68] sm:$0xf0]  ;;  %v1063_v23 = vld [vmem:[#allocation8 + $0x50] sm:$0xf] }
  0x21   :  { %v1436_v24 = vld [vmem:[#allocation8 + $0x54] sm:$0xf0]  ;;  %v1140_v25 = vor.u32 %v1421_v20, %v1137_v22  ;;  %v1435_v26 = vld [vmem:[#allocation8 + $0x54] sm:$0xf]  ;;  %v1065_v27 = vld [vmem:[#allocation8 + $0x58] sm:$0xf0] }
  0x22   :  { %v1127_v28 = vld [vmem:[#allocation7 + $0x50] sm:$0xf]  ;;  %246 = vmatpush.bf16.msra.mxu0 %v1072_v16  ;;  %v1064_v29 = vor.u32 %v1436_v24, %v1063_v23  ;;  %v1420_v30 = vld [vmem:[#allocation7 + $0x54] sm:$0xf0]  ;;  %v1419_v31 = vld [vmem:[#allocation7 + $0x54] sm:$0xf]  ;;  %v1068_v33 = vor.u32 %v1435_v26, %v1065_v27 }
  0x23   :  { %v1129_v32 = vld [vmem:[#allocation7 + $0x58] sm:$0xf0]  ;;  %260 = vmatpush.bf16.msra.mxu1 %v1076_v17  ;;  %v1128_v34 = vor.u32 %v1420_v30, %v1127_v28  ;;  %v1055_v35 = vld [vmem:[#allocation8 + $0x40] sm:$0xf]  ;;  %v1434_v36 = vld [vmem:[#allocation8 + $0x44] sm:$0xf0] }
  0x24   :  { %354 = vmatpush.bf16.msra.mxu2 %v1136_v21  ;;  %v1433_v37 = vld [vmem:[#allocation8 + $0x44] sm:$0xf]  ;;  %368 = vmatpush.bf16.msra.mxu3 %v1140_v25  ;;  %v1132_v38 = vor.u32 %v1419_v31, %v1129_v32  ;;  %v1057_v39 = vld [vmem:[#allocation8 + $0x48] sm:$0xf0]  ;;  %v1119_v40 = vld [vmem:[#allocation7 + $0x40] sm:$0xf]  ;;  %v1056_v44 = vor.u32 %v1434_v36, %v1055_v35 }
  0x25   :  { %v1418_v41 = vld [vmem:[#allocation7 + $0x44] sm:$0xf0]  ;;  %v1417_v42 = vld [vmem:[#allocation7 + $0x44] sm:$0xf]  ;;  %v1121_v43 = vld [vmem:[#allocation7 + $0x48] sm:$0xf0]  ;;  %v1060_v45 = vor.u32 %v1433_v37, %v1057_v39 }
  0x26   :  { %247 = vmatpush.bf16.msra.mxu0 %v1064_v29  ;;  %v1120_v46 = vor.u32 %v1418_v41, %v1119_v40  ;;  %v1047_v47 = vld [vmem:[#allocation8 + $0x30] sm:$0xf]  ;;  %v1432_v48 = vld [vmem:[#allocation8 + $0x34] sm:$0xf0]  ;;  %v1431_v49 = vld [vmem:[#allocation8 + $0x34] sm:$0xf]  ;;  %v1124_v50 = vor.u32 %v1417_v42, %v1121_v43 }
  0x27   :  { %261 = vmatpush.bf16.msra.mxu1 %v1068_v33  ;;  %v1049_v51 = vld [vmem:[#allocation8 + $0x38] sm:$0xf0]  ;;  %v1111_v52 = vld [vmem:[#allocation7 + $0x30] sm:$0xf]  ;;  %v1416_v53 = vld [vmem:[#allocation7 + $0x34] sm:$0xf0]  ;;  %v1048_v56 = vor.u32 %v1432_v48, %v1047_v47 }
  0x28   :  { %355 = vmatpush.bf16.msra.mxu2 %v1128_v34  ;;  %369 = vmatpush.bf16.msra.mxu3 %v1132_v38  ;;  %v1415_v54 = vld [vmem:[#allocation7 + $0x34] sm:$0xf]  ;;  %v1113_v55 = vld [vmem:[#allocation7 + $0x38] sm:$0xf0]  ;;  %v1052_v57 = vor.u32 %v1431_v49, %v1049_v51  ;;  %v1112_v58 = vor.u32 %v1416_v53, %v1111_v52  ;;  %v1039_v59 = vld [vmem:[#allocation8 + $0x20] sm:$0xf] }
  0x29   :  { %v1430_v60 = vld [vmem:[#allocation8 + $0x24] sm:$0xf0]  ;;  %v1429_v61 = vld [vmem:[#allocation8 + $0x24] sm:$0xf]  ;;  %v1116_v62 = vor.u32 %v1415_v54, %v1113_v55  ;;  %v1041_v63 = vld [vmem:[#allocation8 + $0x28] sm:$0xf0] }
  0x2a   :  { %248 = vmatpush.bf16.msra.mxu0 %v1056_v44  ;;  %v1103_v0 = vld [vmem:[#allocation7 + $0x20] sm:$0xf]  ;;  %v1414_v1 = vld [vmem:[#allocation7 + $0x24] sm:$0xf0]  ;;  %v1413_v2 = vld [vmem:[#allocation7 + $0x24] sm:$0xf]  ;;  %v1040_v4 = vor.u32 %v1430_v60, %v1039_v59  ;;  %v1044_v5 = vor.u32 %v1429_v61, %v1041_v63 }
  0x2b   :  { %262 = vmatpush.bf16.msra.mxu1 %v1060_v45  ;;  %v1105_v3 = vld [vmem:[#allocation7 + $0x28] sm:$0xf0]  ;;  %v1104_v6 = vor.u32 %v1414_v1, %v1103_v0  ;;  %v1031_v7 = vld [vmem:[#allocation8 + $0x10] sm:$0xf]  ;;  %v1428_v8 = vld [vmem:[#allocation8 + $0x14] sm:$0xf0] }
  0x2c   :  { %356 = vmatpush.bf16.msra.mxu2 %v1120_v46  ;;  %370 = vmatpush.bf16.msra.mxu3 %v1124_v50  ;;  %v1427_v9 = vld [vmem:[#allocation8 + $0x14] sm:$0xf]  ;;  %v1108_v10 = vor.u32 %v1413_v2, %v1105_v3  ;;  %v1033_v11 = vld [vmem:[#allocation8 + $0x18] sm:$0xf0]  ;;  %v1095_v12 = vld [vmem:[#allocation7 + $0x10] sm:$0xf]  ;;  %v1032_v16 = vor.u32 %v1428_v8, %v1031_v7 }
  0x2d   :  { %v1412_v13 = vld [vmem:[#allocation7 + $0x14] sm:$0xf0]  ;;  %v1411_v14 = vld [vmem:[#allocation7 + $0x14] sm:$0xf]  ;;  %v1097_v15 = vld [vmem:[#allocation7 + $0x18] sm:$0xf0]  ;;  %v1036_v19 = vor.u32 %v1427_v9, %v1033_v11 }
  0x2e   :  { %249 = vmatpush.bf16.msra.mxu0 %v1048_v56  ;;  %v1023_v17 = vld [vmem:[#allocation8] sm:$0xf]  ;;  %v1426_v18 = vld [vmem:[#allocation8 + $0x4] sm:$0xf0]  ;;  %v1096_v20 = vor.u32 %v1412_v13, %v1095_v12  ;;  %v1425_v21 = vld [vmem:[#allocation8 + $0x4] sm:$0xf]  ;;  %v1100_v24 = vor.u32 %v1411_v14, %v1097_v15 }
  0x2f   :  { %263 = vmatpush.bf16.msra.mxu1 %v1052_v57  ;;  %v1025_v22 = vld [vmem:[#allocation8 + $0x8] sm:$0xf0]  ;;  %v1087_v23 = vld [vmem:[#allocation7] sm:$0xf]  ;;  %v1410_v25 = vld [vmem:[#allocation7 + $0x4] sm:$0xf0]  ;;  %v1024_v31 = vor.u32 %v1426_v18, %v1023_v17 }
  0x30   :  { %357 = vmatpush.bf16.msra.mxu2 %v1112_v58  ;;  %371 = vmatpush.bf16.msra.mxu3 %v1116_v62  ;;  %v1409_v26 = vld [vmem:[#allocation7 + $0x4] sm:$0xf]  ;;  %v1089_v27 = vld [vmem:[#allocation7 + $0x8] sm:$0xf0]  ;;  %v130_v28 = vld [vmem:[#allocation5] sm:$0xff]  ;;  %v1028_v35 = vor.u32 %v1425_v21, %v1025_v22  ;;  %v1088_v36 = vor.u32 %v1410_v25, %v1087_v23  ;;  %s1005_s21 = sshll.u32 %s1828_s9, 4  ;;  %s1006_s21 = int_to_ptr.hbm [resolvable:$true] %s1005_s21 }
  0x31   :  { %v1207_v29 = vld [vmem:[#allocation10 + $0x70] sm:$0xf]  ;;  %v1456_v30 = vld [vmem:[#allocation10 + $0x74] sm:$0xf0]  ;;  %v127_v37 = vld [vmem:[#allocation2] sm:$0xff]  ;;  %v1092_v39 = vor.u32 %v1409_v26, %v1089_v27  ;;  %s1719_s22 = smov 256  }
  0x32   :  { %250 = vmatpush.bf16.msra.mxu0 %v1040_v4  ;;  %v131_v32 = vld [vmem:[#allocation5 + $0x8] sm:$0xff]  ;;  %v1271_v33 = vld [vmem:[#allocation10 + $0xf0] sm:$0xf]  ;;  %v128_v38 = vld [vmem:[#allocation2 + $0x8] sm:$0xff]  ;;  %v1208_v40 = vor.u32 %v1456_v30, %v1207_v29  ;;  %s1720_s1 = smov 16  }
  0x33   :  { %264 = vmatpush.bf16.msra.mxu1 %v1044_v5  ;;  %v1472_v34 = vld [vmem:[#allocation10 + $0xf4] sm:$0xf0]  ;;  %v1455_v41 = vld [vmem:[#allocation10 + $0x74] sm:$0xf]  ;;  %v1209_v42 = vld [vmem:[#allocation10 + $0x78] sm:$0xf0]  ;;  %v132_v44 = vpack.c.bf16 %v131_v32, %v130_v28  ;;  %v129_v49 = vpack.c.bf16 %v128_v38, %v127_v37 }
  0x34   :  { %358 = vmatpush.bf16.msra.mxu2 %v1104_v6  ;;  %372 = vmatpush.bf16.msra.mxu3 %v1108_v10  ;;  %v1471_v43 = vld [vmem:[#allocation10 + $0xf4] sm:$0xf]  ;;  %v1272_v45 = vor.u32 %v1472_v34, %v1271_v33  ;;  %v1273_v46 = vld [vmem:[#allocation10 + $0xf8] sm:$0xf0]  ;;  %v1199_v47 = vld [vmem:[#allocation10 + $0x60] sm:$0xf]  ;;  %v1212_v52 = vor.u32 %v1455_v41, %v1209_v42 }
  0x35   :  { %v1454_v48 = vld [vmem:[#allocation10 + $0x64] sm:$0xf0]  ;;  %v1263_v50 = vld [vmem:[#allocation10 + $0xe0] sm:$0xf]  ;;  %v1276_v53 = vor.u32 %v1471_v43, %v1273_v46  ;;  %v1453_v55 = vld [vmem:[#allocation10 + $0x64] sm:$0xf] }
  0x36   :  { %251 = vmatpush.bf16.msra.mxu0 %v1032_v16  ;;  %v1470_v51 = vld [vmem:[#allocation10 + $0xe4] sm:$0xf0]  ;;  %v1200_v54 = vor.u32 %v1454_v48, %v1199_v47  ;;  %v1201_v56 = vld [vmem:[#allocation10 + $0x68] sm:$0xf0]  ;;  %v1469_v58 = vld [vmem:[#allocation10 + $0xe4] sm:$0xf] }
  0x37   :  { %265 = vmatpush.bf16.msra.mxu1 %v1036_v19  ;;  %v1264_v57 = vor.u32 %v1470_v51, %v1263_v50  ;;  %v1265_v59 = vld [vmem:[#allocation10 + $0xe8] sm:$0xf0]  ;;  %v1204_v60 = vor.u32 %v1453_v55, %v1201_v56  ;;  %v1191_v62 = vld [vmem:[#allocation10 + $0x50] sm:$0xf]  ;;  %v1452_v63 = vld [vmem:[#allocation10 + $0x54] sm:$0xf0] }
  0x38   :  { %359 = vmatpush.bf16.msra.mxu2 %v1096_v20  ;;  %373 = vmatpush.bf16.msra.mxu3 %v1100_v24  ;;  %v1268_v61 = vor.u32 %v1469_v58, %v1265_v59  ;;  %v1255_v0 = vld [vmem:[#allocation10 + $0xd0] sm:$0xf]  ;;  %v1192_v1 = vor.u32 %v1452_v63, %v1191_v62  ;;  %v1468_v2 = vld [vmem:[#allocation10 + $0xd4] sm:$0xf0]  ;;  %v1451_v3 = vld [vmem:[#allocation10 + $0x54] sm:$0xf] }
  0x39   :  { %v1193_v4 = vld [vmem:[#allocation10 + $0x58] sm:$0xf0]  ;;  %v1256_v5 = vor.u32 %v1468_v2, %v1255_v0  ;;  %v1467_v7 = vld [vmem:[#allocation10 + $0xd4] sm:$0xf]  ;;  %v1183_v10 = vld [vmem:[#allocation10 + $0x40] sm:$0xf] }
  0x3a   :  { %252 = vmatpush.bf16.msra.mxu0 %v1024_v31  ;;  %v1196_v6 = vor.u32 %v1451_v3, %v1193_v4  ;;  %v1257_v8 = vld [vmem:[#allocation10 + $0xd8] sm:$0xf0]  ;;  %v1450_v11 = vld [vmem:[#allocation10 + $0x44] sm:$0xf0]  ;;  %v1247_v12 = vld [vmem:[#allocation10 + $0xc0] sm:$0xf] }
  0x3b   :  { %266 = vmatpush.bf16.msra.mxu1 %v1028_v35  ;;  %v1260_v9 = vor.u32 %v1467_v7, %v1257_v8  ;;  %v1184_v13 = vor.u32 %v1450_v11, %v1183_v10  ;;  %v1466_v14 = vld [vmem:[#allocation10 + $0xc4] sm:$0xf0]  ;;  %v1449_v15 = vld [vmem:[#allocation10 + $0x44] sm:$0xf]  ;;  %v1185_v16 = vld [vmem:[#allocation10 + $0x48] sm:$0xf0] }
  0x3c   :  { %360 = vmatpush.bf16.msra.mxu2 %v1088_v36  ;;  %374 = vmatpush.bf16.msra.mxu3 %v1092_v39  ;;  %v1248_v17 = vor.u32 %v1466_v14, %v1247_v12  ;;  %v1188_v18 = vor.u32 %v1449_v15, %v1185_v16  ;;  %v1465_v19 = vld [vmem:[#allocation10 + $0xc4] sm:$0xf]  ;;  %v1249_v20 = vld [vmem:[#allocation10 + $0xc8] sm:$0xf0]  ;;  %v1175_v22 = vld [vmem:[#allocation10 + $0x30] sm:$0xf] }
  0x3d   :  { %253 = vmatmul.bf16.vlgmr.msra.gmra.mxu0 %v132_v44  ;;  %v1252_v21 = vor.u32 %v1465_v19, %v1249_v20  ;;  %v1448_v23 = vld [vmem:[#allocation10 + $0x34] sm:$0xf0]  ;;  %v1239_v25 = vld [vmem:[#allocation10 + $0xb0] sm:$0xf]  ;;  %v1447_v27 = vld [vmem:[#allocation10 + $0x34] sm:$0xf] }
  0x3e   :  { %599 = vmatpush.bf16.msrb.mxu0 %v1208_v40  ;;  %267 = vmatmul.bf16.vlgmr.msra.gmra.mxu1 %v132_v44  ;;  %v1176_v24 = vor.u32 %v1448_v23, %v1175_v22  ;;  %v1464_v26 = vld [vmem:[#allocation10 + $0xb4] sm:$0xf0]  ;;  %v1177_v29 = vld [vmem:[#allocation10 + $0x38] sm:$0xf0]  ;;  %v1463_v30 = vld [vmem:[#allocation10 + $0xb4] sm:$0xf] }
  0x3f   :  { %613 = vmatpush.bf16.msrb.mxu1 %v1272_v45  ;;  %361 = vmatmul.bf16.vlgmr.msra.gmra.mxu2 %v129_v49  ;;  %v1240_v28 = vor.u32 %v1464_v26, %v1239_v25  ;;  %v1241_v31 = vld [vmem:[#allocation10 + $0xb8] sm:$0xf0]  ;;  %v1180_v32 = vor.u32 %v1447_v27, %v1177_v29  ;;  %v1167_v34 = vld [vmem:[#allocation10 + $0x20] sm:$0xf]  ;;  %v1446_v35 = vld [vmem:[#allocation10 + $0x24] sm:$0xf0] }
  0x40   :  { %375 = vmatmul.bf16.vlgmr.msra.gmra.mxu3 %v129_v49  ;;  %627 = vmatpush.bf16.msrb.mxu2 %v1212_v52  ;;  %v1244_v33 = vor.u32 %v1463_v30, %v1241_v31  ;;  %v1231_v36 = vld [vmem:[#allocation10 + $0xa0] sm:$0xf]  ;;  %v1168_v37 = vor.u32 %v1446_v35, %v1167_v34  ;;  %v1462_v38 = vld [vmem:[#allocation10 + $0xa4] sm:$0xf0]  ;;  %v1445_v39 = vld [vmem:[#allocation10 + $0x24] sm:$0xf] }
  0x41   :  { %641 = vmatpush.bf16.msrb.mxu3 %v1276_v53  ;;  %v1169_v40 = vld [vmem:[#allocation10 + $0x28] sm:$0xf0]  ;;  %v1232_v41 = vor.u32 %v1462_v38, %v1231_v36  ;;  %v1461_v43 = vld [vmem:[#allocation10 + $0xa4] sm:$0xf]  ;;  %v1159_v46 = vld [vmem:[#allocation10 + $0x10] sm:$0xf] }
  0x42   :  { %600 = vmatpush.bf16.msrb.mxu0 %v1200_v54  ;;  %v1172_v42 = vor.u32 %v1445_v39, %v1169_v40  ;;  %v1233_v44 = vld [vmem:[#allocation10 + $0xa8] sm:$0xf0]  ;;  %v1444_v47 = vld [vmem:[#allocation10 + $0x14] sm:$0xf0]  ;;  %v1223_v48 = vld [vmem:[#allocation10 + $0x90] sm:$0xf] }
  0x43   :  { %614 = vmatpush.bf16.msrb.mxu1 %v1264_v57  ;;  %v1236_v45 = vor.u32 %v1461_v43, %v1233_v44  ;;  %v1160_v49 = vor.u32 %v1444_v47, %v1159_v46  ;;  %v1460_v50 = vld [vmem:[#allocation10 + $0x94] sm:$0xf0]  ;;  %v1443_v51 = vld [vmem:[#allocation10 + $0x14] sm:$0xf]  ;;  %v1161_v52 = vld [vmem:[#allocation10 + $0x18] sm:$0xf0] }
  0x44   :  { %628 = vmatpush.bf16.msrb.mxu2 %v1204_v60  ;;  %v1224_v53 = vor.u32 %v1460_v50, %v1223_v48  ;;  %v1164_v54 = vor.u32 %v1443_v51, %v1161_v52  ;;  %v1459_v55 = vld [vmem:[#allocation10 + $0x94] sm:$0xf]  ;;  %v1225_v56 = vld [vmem:[#allocation10 + $0x98] sm:$0xf0]  ;;  %v1151_v58 = vld [vmem:[#allocation10] sm:$0xf] }
  0x45   :  { %642 = vmatpush.bf16.msrb.mxu3 %v1268_v61  ;;  %v1228_v57 = vor.u32 %v1459_v55, %v1225_v56  ;;  %v1442_v59 = vld [vmem:[#allocation10 + $0x4] sm:$0xf0]  ;;  %v1215_v60 = vld [vmem:[#allocation10 + $0x80] sm:$0xf]  ;;  %v1441_v63 = vld [vmem:[#allocation10 + $0x4] sm:$0xf] }
  0x46   :  { %601 = vmatpush.bf16.msrb.mxu0 %v1192_v1  ;;  %v1152_v61 = vor.u32 %v1442_v59, %v1151_v58  ;;  %v1458_v62 = vld [vmem:[#allocation10 + $0x84] sm:$0xf0]  ;;  %v1153_v0 = vld [vmem:[#allocation10 + $0x8] sm:$0xf0]  ;;  %v1457_v3 = vld [vmem:[#allocation10 + $0x84] sm:$0xf] }
  0x47   :  { %615 = vmatpush.bf16.msrb.mxu1 %v1256_v5  ;;  %v1216_v1 = vor.u32 %v1458_v62, %v1215_v60  ;;  %v1156_v2 = vor.u32 %v1441_v63, %v1153_v0  ;;  %v1217_v4 = vld [vmem:[#allocation10 + $0x88] sm:$0xf0]  ;;  %v1488_v7 = vld [vmem:[#allocation11 + $0x74] sm:$0xf0]  ;;  %v1487_v8 = vld [vmem:[#allocation11 + $0x74] sm:$0xf] }
  0x48   :  { %629 = vmatpush.bf16.msrb.mxu2 %v1196_v6  ;;  %v1220_v5 = vor.u32 %v1457_v3, %v1217_v4  ;;  %v1335_v6 = vld [vmem:[#allocation11 + $0x70] sm:$0xf]  ;;  %v1337_v10 = vld [vmem:[#allocation11 + $0x78] sm:$0xf0]  ;;  %v1327_v11 = vld [vmem:[#allocation11 + $0x60] sm:$0xf] }
  0x49   :  { %643 = vmatpush.bf16.msrb.mxu3 %v1260_v9  ;;  %v1336_v9 = vor.u32 %v1488_v7, %v1335_v6  ;;  %v1486_v12 = vld [vmem:[#allocation11 + $0x64] sm:$0xf0]  ;;  %v1485_v14 = vld [vmem:[#allocation11 + $0x64] sm:$0xf]  ;;  %v1329_v15 = vld [vmem:[#allocation11 + $0x68] sm:$0xf0] }
  0x4a   :  { %602 = vmatpush.bf16.msrb.mxu0 %v1184_v13  ;;  %v1340_v13 = vor.u32 %v1487_v8, %v1337_v10  ;;  %v1399_v16 = vld [vmem:[#allocation11 + $0xf0] sm:$0xf]  ;;  %v1503_v19 = vld [vmem:[#allocation11 + $0xf4] sm:$0xf]  ;;  %v1401_v20 = vld [vmem:[#allocation11 + $0xf8] sm:$0xf0] }
  0x4b   :  { %616 = vmatpush.bf16.msrb.mxu1 %v1248_v17  ;;  %v1328_v17 = vor.u32 %v1486_v12, %v1327_v11  ;;  %v1404_v23 = vor.u32 %v1503_v19, %v1401_v20  ;;  %v1484_v25 = vld [vmem:[#allocation11 + $0x54] sm:$0xf0]  ;;  %v1483_v26 = vld [vmem:[#allocation11 + $0x54] sm:$0xf]  ;;  %v1321_v27 = vld [vmem:[#allocation11 + $0x58] sm:$0xf0] }
  0x4c   :  { %630 = vmatpush.bf16.msrb.mxu2 %v1188_v18  ;;  %v1504_v18 = vld [vmem:[#allocation11 + $0xf4] sm:$0xf0]  ;;  %v1502_v29 = vld [vmem:[#allocation11 + $0xe4] sm:$0xf0]  ;;  %v1501_v31 = vld [vmem:[#allocation11 + $0xe4] sm:$0xf]  ;;  %v1324_v35 = vor.u32 %v1483_v26, %v1321_v27 }
  0x4d   :  { %644 = vmatpush.bf16.msrb.mxu3 %v1252_v21  ;;  %v1332_v21 = vor.u32 %v1485_v14, %v1329_v15  ;;  %v1400_v22 = vor.u32 %v1504_v18, %v1399_v16  ;;  %v381_v39 = vld [vmem:[%s1823_s4] sm:$0x3]  ;;  %v1481_v3 = vld [vmem:[#allocation11 + $0x44] sm:$0xf]  ;;  %v1383_v7 = vld [vmem:[#allocation11 + $0xd0] sm:$0xf] }
  0x4e   :  { %603 = vmatpush.bf16.msrb.mxu0 %v1176_v24  ;;  %v1319_v24 = vld [vmem:[#allocation11 + $0x50] sm:$0xf]  ;;  %v384_v44 = vperm.slane %v381_v39, 1  ;;  %v1500_v8 = vld [vmem:[#allocation11 + $0xd4] sm:$0xf0] }
  0x4f   :  { %617 = vmatpush.bf16.msrb.mxu1 %v1240_v28  ;;  %v1391_v28 = vld [vmem:[#allocation11 + $0xe0] sm:$0xf]  ;;  %v1384_v10 = vor.u32 %v1500_v8, %v1383_v7  ;;  %v1385_v11 = vld [vmem:[#allocation11 + $0xd8] sm:$0xf0]  ;;  %v1480_v14 = vld [vmem:[#allocation11 + $0x34] sm:$0xf0] }
  0x50   :  { %631 = vmatpush.bf16.msrb.mxu2 %v1180_v32  ;;  %v1392_v30 = vor.u32 %v1502_v29, %v1391_v28  ;;  %v1393_v32 = vld [vmem:[#allocation11 + $0xe8] sm:$0xf0]  ;;  %v1479_v15 = vld [vmem:[#allocation11 + $0x34] sm:$0xf]  ;;  %v1375_v19 = vld [vmem:[#allocation11 + $0xc0] sm:$0xf] }
  0x51   :  { %645 = vmatpush.bf16.msrb.mxu3 %v1244_v33  ;;  %v1320_v33 = vor.u32 %v1484_v25, %v1319_v24  ;;  %v1396_v34 = vor.u32 %v1501_v31, %v1393_v32  ;;  %v1498_v20 = vld [vmem:[#allocation11 + $0xc4] sm:$0xf0]  ;;  %v1295_v25 = vld [vmem:[#allocation11 + $0x20] sm:$0xf]  ;;  %v1477_v28 = vld [vmem:[#allocation11 + $0x24] sm:$0xf] }
  0x52   :  { %604 = vmatpush.bf16.msrb.mxu0 %v1168_v37  ;;  %v1478_v26 = vld [vmem:[#allocation11 + $0x24] sm:$0xf0]  ;;  %v1297_v29 = vld [vmem:[#allocation11 + $0x28] sm:$0xf0]  ;;  %v1367_v31 = vld [vmem:[#allocation11 + $0xb0] sm:$0xf] }
  0x53   :  { %618 = vmatpush.bf16.msrb.mxu1 %v1232_v41  ;;  %v1296_v27 = vor.u32 %v1478_v26, %v1295_v25  ;;  %v1496_v32 = vld [vmem:[#allocation11 + $0xb4] sm:$0xf0] }
  0x54   :  { %632 = vmatpush.bf16.msrb.mxu2 %v1172_v42  ;;  %v383_v42 = vperm.slane %v381_v39, 0  ;;  %v1475_v39 = vld [vmem:[#allocation11 + $0x14] sm:$0xf] }
  0x55   :  { %646 = vmatpush.bf16.msrb.mxu3 %v1236_v45 }
  0x56   :  { %605 = vmatpush.bf16.msrb.mxu0 %v1160_v49 }
  0x57   :  { %619 = vmatpush.bf16.msrb.mxu1 %v1224_v53 }
  0x58   :  { %633 = vmatpush.bf16.msrb.mxu2 %v1164_v54 }
  0x59   :  { %647 = vmatpush.bf16.msrb.mxu3 %v1228_v57 }
  0x5a   :  { %606 = vmatpush.bf16.msrb.mxu0 %v1152_v61 }
  0x5b   :  { %620 = vmatpush.bf16.msrb.mxu1 %v1216_v1  ;;  %v1311_v1 = vld [vmem:[#allocation11 + $0x40] sm:$0xf] }
  0x5c   :  { %634 = vmatpush.bf16.msrb.mxu2 %v1156_v2  ;;  %v1482_v2 = vld [vmem:[#allocation11 + $0x44] sm:$0xf0] }
  0x5d   :  { %648 = vmatpush.bf16.msrb.mxu3 %v1220_v5  ;;  %v1312_v4 = vor.u32 %v1482_v2, %v1311_v1  ;;  %v1313_v5 = vld [vmem:[#allocation11 + $0x48] sm:$0xf0] }
  0x5e   :  { %863 = vmatpush.bf16.msra.mxu0 %v1336_v9  ;;  %v1316_v6 = vor.u32 %v1481_v3, %v1313_v5  ;;  %v1499_v9 = vld [vmem:[#allocation11 + $0xd4] sm:$0xf]  ;;  %v1345_v1 = vld [vmem:[#allocation11 + $0x88] sm:$0xf0]  ;;  %v433_v3 = vld [vmem:[%s1825_s6] sm:$0x3] }
  0x5f   :  { %877 = vmatpush.bf16.msra.mxu1 %v1400_v22  ;;  %v1388_v12 = vor.u32 %v1499_v9, %v1385_v11  ;;  %v1376_v22 = vor.u32 %v1498_v20, %v1375_v19  ;;  %v436_v8 = vperm.slane %v433_v3, 1 }
  0x60   :  { %891 = vmatpush.bf16.msra.mxu2 %v1340_v13  ;;  %v1303_v13 = vld [vmem:[#allocation11 + $0x30] sm:$0xf] }
  0x61   :  { %905 = vmatpush.bf16.msra.mxu3 %v1404_v23  ;;  %v1304_v16 = vor.u32 %v1480_v14, %v1303_v13  ;;  %v1377_v23 = vld [vmem:[#allocation11 + $0xc8] sm:$0xf0] }
  0x62   :  { %864 = vmatpush.bf16.msra.mxu0 %v1328_v17  ;;  %v1305_v17 = vld [vmem:[#allocation11 + $0x38] sm:$0xf0] }
  0x63   :  { %878 = vmatpush.bf16.msra.mxu1 %v1392_v30  ;;  %v1308_v18 = vor.u32 %v1479_v15, %v1305_v17  ;;  %v1300_v30 = vor.u32 %v1477_v28, %v1297_v29 }
  0x64   :  { %892 = vmatpush.bf16.msra.mxu2 %v1332_v21  ;;  %v1497_v21 = vld [vmem:[#allocation11 + $0xc4] sm:$0xf] }
  0x65   :  { %906 = vmatpush.bf16.msra.mxu3 %v1396_v34  ;;  %v1380_v24 = vor.u32 %v1497_v21, %v1377_v23  ;;  %v1368_v34 = vor.u32 %v1496_v32, %v1367_v31  ;;  %v697_v32 = vld [vmem:[%s1827_s8] sm:$0x3]  ;;  %s1718_s8 = smov [#allocation13]  }
  0x66   :  { %865 = vmatpush.bf16.msra.mxu0 %v1320_v33  ;;  %v1495_v33 = vld [vmem:[#allocation11 + $0xb4] sm:$0xf]  ;;  %s1003_s18 = sshll.u32 %s1718_s8, 4  ;;  %s1004_s18 = int_to_ptr.vmem [resolvable:$true] %s1003_s18 }
  0x67   :  { %879 = vmatpush.bf16.msra.mxu1 %v1384_v10 }
  0x68   :  { %893 = vmatpush.bf16.msra.mxu2 %v1324_v35  ;;  %v1369_v35 = vld [vmem:[#allocation11 + $0xb8] sm:$0xf0] }
  0x69   :  { %907 = vmatpush.bf16.msra.mxu3 %v1388_v12 }
  0x6a   :  { %866 = vmatpush.bf16.msra.mxu0 %v1312_v4  ;;  %v435_v4 = vperm.slane %v433_v3, 0 }
  0x6b   :  { %880 = vmatpush.bf16.msra.mxu1 %v1376_v22 }
  0x6c   :  { %894 = vmatpush.bf16.msra.mxu2 %v1316_v6 }
  0x6d   :  { %908 = vmatpush.bf16.msra.mxu3 %v1380_v24 }
  0x6e   :  { %867 = vmatpush.bf16.msra.mxu0 %v1304_v16 }
  0x6f   :  { %881 = vmatpush.bf16.msra.mxu1 %v1368_v34  ;;  %v699_v34 = vperm.slane %v697_v32, 0 }
  0x70   :  { %895 = vmatpush.bf16.msra.mxu2 %v1308_v18 }
  0x72   :  { %868 = vmatpush.bf16.msra.mxu0 %v1296_v27 }
  0x74   :  { %896 = vmatpush.bf16.msra.mxu2 %v1300_v30 }
  0xba   :  { %v254_v36 = vpop.f32.mrf.mxu0 }
  0xbb   :  { %v268_v37 = vpop.f32.mrf.mxu1 }
  0xc2   :  { %v362_v38 = vpop.f32.mrf.mxu2  ;;  %v256_v47 = vpop.f32.mrf.mxu0 }
  0xc3   :  { %v376_v40 = vpop.f32.mrf.mxu3  ;;  %v363_v41 = vadd.f32 %v362_v38, %v254_v36  ;;  %v270_v49 = vpop.f32.mrf.mxu1  ;;  %v1372_v36 = vor.u32 %v1495_v33, %v1369_v35  ;;  %v1476_v38 = vld [vmem:[#allocation11 + $0x14] sm:$0xf0] }
  0xc4   :  { %v377_v43 = vadd.f32 %v376_v40, %v268_v37  ;;  %v1287_v37 = vld [vmem:[#allocation11 + $0x10] sm:$0xf] }
  0xc5   :  { %v387_v45 = vadd.f32 %v383_v42, %v363_v41  ;;  %v1288_v40 = vor.u32 %v1476_v38, %v1287_v37  ;;  %v1289_v41 = vld [vmem:[#allocation11 + $0x18] sm:$0xf0]  ;;  %909 = vmatpush.bf16.msra.mxu3 %v1372_v36 }
  0xc6   :  { %v388_v46 = vadd.f32 %v384_v44, %v377_v43  ;;  %v1359_v43 = vld [vmem:[#allocation11 + $0xa0] sm:$0xf] }
  0xc7   :  { %v391_v53 = vmul.f32 0.01, %v387_v45  ;;  %869 = vmatpush.bf16.msra.mxu0 %v1288_v40 }
  0xc8   :  { %v392_v55 = vmul.f32 0.01, %v388_v46 }
  0xc9   :  { %v395_v59 = vmax.f32 %v387_v45, %v391_v53  ;;  %v1493_v45 = vld [vmem:[#allocation11 + $0xa4] sm:$0xf]  ;;  %v1281_v53 = vld [vmem:[#allocation11 + $0x8] sm:$0xf0] }
  0xca   :  { %v364_v48 = vpop.f32.mrf.mxu2  ;;  %v396_v61 = vmax.f32 %v388_v46, %v392_v55  ;;  %v1351_v55 = vld [vmem:[#allocation11 + $0x90] sm:$0xf] }
  0xcb   :  { %v365_v50 = vadd.f32 %v364_v48, %v256_v47  ;;  %v378_v51 = vpop.f32.mrf.mxu3  ;;  %v1361_v47 = vld [vmem:[#allocation11 + $0xa8] sm:$0xf0] }
  0xcc   :  { %v379_v52 = vadd.f32 %v378_v51, %v270_v49  ;;  %v1364_v48 = vor.u32 %v1493_v45, %v1361_v47  ;;  %v1279_v49 = vld [vmem:[#allocation11] sm:$0xf]  ;;  %v1473_v51 = vld [vmem:[#allocation11 + $0x4] sm:$0xf] }
  0xcd   :  { %v389_v54 = vadd.f32 %v383_v42, %v365_v50  ;;  %v1292_v42 = vor.u32 %v1475_v39, %v1289_v41  ;;  %v1474_v50 = vld [vmem:[#allocation11 + $0x4] sm:$0xf0]  ;;  %v700_v39 = vperm.slane %v697_v32, 1 }
  0xce   :  { %v390_v56 = vadd.f32 %v384_v44, %v379_v52  ;;  %v1494_v44 = vld [vmem:[#allocation11 + $0xa4] sm:$0xf0]  ;;  %v1280_v52 = vor.u32 %v1474_v50, %v1279_v49  ;;  %910 = vmatpush.bf16.msra.mxu3 %v1364_v48 }
  0xcf   :  { %v393_v57 = vmul.f32 0.01, %v389_v54  ;;  %v1360_v46 = vor.u32 %v1494_v44, %v1359_v43  ;;  %897 = vmatpush.bf16.msra.mxu2 %v1292_v42 }
  0xd0   :  { %v394_v58 = vmul.f32 0.01, %v390_v56  ;;  %870 = vmatpush.bf16.msra.mxu0 %v1280_v52 }
  0xd1   :  { %v397_v60 = vmax.f32 %v389_v54, %v393_v57  ;;  %882 = vmatpush.bf16.msra.mxu1 %v1360_v46  ;;  %v1284_v54 = vor.u32 %v1473_v51, %v1281_v53  ;;  %v1491_v57 = vld [vmem:[#allocation11 + $0x94] sm:$0xf] }
  0xd2   :  { %v398_v62 = vmax.f32 %v390_v56, %v394_v58  ;;  %v1492_v56 = vld [vmem:[#allocation11 + $0x94] sm:$0xf0] }
  0xd3   :  { %v399_v63 = vpack.c.bf16 %v397_v60, %v395_v59  ;;  %v1352_v58 = vor.u32 %v1492_v56, %v1351_v55  ;;  %v1353_v59 = vld [vmem:[#allocation11 + $0x98] sm:$0xf0]  ;;  %898 = vmatpush.bf16.msra.mxu2 %v1284_v54 }
  0xd4   :  { %v400_v0 = vpack.c.bf16 %v398_v62, %v396_v61  ;;  %v1356_v60 = vor.u32 %v1491_v57, %v1353_v59  ;;  %v1343_v61 = vld [vmem:[#allocation11 + $0x80] sm:$0xf]  ;;  %v1490_v62 = vld [vmem:[#allocation11 + $0x84] sm:$0xf0] }
  0xd5   :  { %607 = vmatmul.bf16.vlgmr.msrb.gmra.mxu0 %v399_v63  ;;  %635 = vmatmul.bf16.vlgmr.msrb.gmra.mxu2 %v399_v63  ;;  %v1489_v63 = vld [vmem:[#allocation11 + $0x84] sm:$0xf] }
  0xd6   :  { %621 = vmatmul.bf16.vlgmr.msrb.gmra.mxu1 %v400_v0  ;;  %649 = vmatmul.bf16.vlgmr.msrb.gmra.mxu3 %v400_v0  ;;  %v1344_v0 = vor.u32 %v1490_v62, %v1343_v61  ;;  %v1348_v2 = vor.u32 %v1489_v63, %v1345_v1 }
  0xd7   :  { %883 = vmatpush.bf16.msra.mxu1 %v1352_v58  ;;  %911 = vmatpush.bf16.msra.mxu3 %v1356_v60 }
  0xdb   :  { %884 = vmatpush.bf16.msra.mxu1 %v1344_v0  ;;  %912 = vmatpush.bf16.msra.mxu3 %v1348_v2 }
 0x152   :  { %v608_v5 = vpop.f32.mrf.mxu0 }
 0x153   :  { %v622_v6 = vpop.f32.mrf.mxu1  ;;  %v609_v7 = vadd.f32 %v608_v5, %v435_v4 }
 0x155   :  { %v623_v10 = vadd.f32 %v622_v6, %v609_v7 }
 0x157   :  { %v655_v16 = vmul.f32 0.01, %v623_v10 }
 0x158   :  { %v636_v9 = vpop.f32.mrf.mxu2 }
 0x159   :  { %v650_v11 = vpop.f32.mrf.mxu3  ;;  %v637_v13 = vadd.f32 %v636_v9, %v436_v8  ;;  %v659_v21 = vmax.f32 %v623_v10, %v655_v16 }
 0x15a   :  { %v610_v12 = vpop.f32.mrf.mxu0 }
 0x15b   :  { %v611_v14 = vadd.f32 %v610_v12, %v435_v4  ;;  %v624_v15 = vpop.f32.mrf.mxu1  ;;  %v651_v18 = vadd.f32 %v650_v11, %v637_v13 }
 0x15d   :  { %v625_v17 = vadd.f32 %v624_v15, %v611_v14  ;;  %v656_v25 = vmul.f32 0.01, %v651_v18 }
 0x15f   :  { %v657_v19 = vmul.f32 0.01, %v625_v17  ;;  %v660_v29 = vmax.f32 %v651_v18, %v656_v25 }
 0x160   :  { %v638_v20 = vpop.f32.mrf.mxu2 }
 0x161   :  { %v661_v22 = vmax.f32 %v625_v17, %v657_v19  ;;  %v639_v23 = vadd.f32 %v638_v20, %v436_v8  ;;  %v652_v24 = vpop.f32.mrf.mxu3 }
 0x163   :  { %v663_v26 = vpack.c.bf16 %v661_v22, %v659_v21  ;;  %v653_v27 = vadd.f32 %v652_v24, %v639_v23 }
 0x165   :  { %v658_v28 = vmul.f32 0.01, %v653_v27  ;;  %871 = vmatmul.bf16.vlgmr.msra.gmra.mxu0 %v663_v26  ;;  %899 = vmatmul.bf16.vlgmr.msra.gmra.mxu2 %v663_v26 }
 0x167   :  { %v662_v30 = vmax.f32 %v653_v27, %v658_v28 }
 0x169   :  { %v664_v31 = vpack.c.bf16 %v662_v30, %v660_v29 }
 0x16b   :  { %885 = vmatmul.bf16.vlgmr.msra.gmra.mxu1 %v664_v31  ;;  %913 = vmatmul.bf16.vlgmr.msra.gmra.mxu3 %v664_v31 }
 0x1e2   :  { %v872_v33 = vpop.f32.mrf.mxu0 }
 0x1e3   :  { %v873_v35 = vadd.f32 %v872_v33, %v699_v34 }
 0x1e8   :  { %v886_v36 = vpop.f32.mrf.mxu1  ;;  %v900_v37 = vpop.f32.mrf.mxu2 }
 0x1e9   :  { %v887_v38 = vadd.f32 %v886_v36, %v873_v35  ;;  %v901_v42 = vadd.f32 %v900_v37, %v700_v39 }
 0x1ea   :  { %v874_v41 = vpop.f32.mrf.mxu0 }
 0x1eb   :  { %v1405_v40 = vmul.f32 -1.442695, %v887_v38  ;;  %v875_v44 = vadd.f32 %v874_v41, %v699_v34 }
 0x1ed   :  { %1516 = vpow2.f32 %v1405_v40 }
 0x1ee   :  { %v914_v43 = vpop.f32.mrf.mxu3 }
 0x1ef   :  { %v915_v45 = vadd.f32 %v914_v43, %v901_v42 }
 0x1f0   :  { %v888_v46 = vpop.f32.mrf.mxu1  ;;  %v902_v49 = vpop.f32.mrf.mxu2 }
 0x1f1   :  { %v1406_v47 = vmul.f32 -1.442695, %v915_v45  ;;  %v889_v48 = vadd.f32 %v888_v46, %v875_v44  ;;  %v903_v53 = vadd.f32 %v902_v49, %v700_v39 }
 0x1f3   :  { %v1517_v50 = vpop.eup %1516  ;;  %1518 = vpow2.f32 %v1406_v47  ;;  %v1407_v51 = vmul.f32 -1.442695, %v889_v48 }
 0x1f4   :  { %v931_v52 = vadd.f32 1.0, %v1517_v50 }
 0x1f5   :  { %1520 = vpow2.f32 %v1407_v51 }
 0x1f6   :  { %1522 = vrcp.f32 %v931_v52  ;;  %v916_v54 = vpop.f32.mrf.mxu3  ;;  %v946_v0 = vand.u32 2147483648, %v931_v52  ;;  %v944_v3 = vand.u32 2147483647, %v931_v52  ;;  %vm940_vm1 = vweird.f32 %v931_v52 }
 0x1f7   :  { %v917_v55 = vadd.f32 %v916_v54, %v903_v53 }
 0x1f8   :  { %v947_v8 = vor.u32 1.1754944e-38, %v946_v0  ;;  %vm945_vm3 = vcmp.eq.f32.partialorder %v944_v3, 8.507059e+37 }
 0x1f9   :  { %v1519_v56 = vpop.eup %1518  ;;  %v1408_v57 = vmul.f32 -1.442695, %v917_v55 }
 0x1fa   :  { %v932_v58 = vadd.f32 1.0, %v1519_v56 }
 0x1fb   :  { %v1521_v59 = vpop.eup %1520  ;;  %1524 = vpow2.f32 %v1408_v57 }
 0x1fc   :  { %v1523_v60 = vpop.eup %1522  ;;  %1526 = vrcp.f32 %v932_v58  ;;  %v933_v62 = vadd.f32 1.0, %v1521_v59  ;;  %v961_v13 = vand.u32 2147483648, %v932_v58  ;;  %v959_v16 = vand.u32 2147483647, %v932_v58 }
 0x1fd   :  { %v936_v61 = vmul.f32 %v1523_v60, %v931_v52  ;;  %vm941_vm0 = vweird.f32 %v1523_v60  ;;  %vm955_vm5 = vweird.f32 %v932_v58 }
 0x1fe   :  { %1528 = vrcp.f32 %v933_v62  ;;  %vm942_vm2 = vmor %vm940_vm1, %vm941_vm0  ;;  %v976_v19 = vand.u32 2147483648, %v933_v62  ;;  %v962_v21 = vor.u32 1.1754944e-38, %v961_v13  ;;  %v974_v23 = vand.u32 2147483647, %v933_v62 }
 0x1ff   :  { %v937_v63 = vsub.f32 1.0, %v936_v61  ;;  %vm960_vm8 = vcmp.eq.f32.partialorder %v959_v16, 8.507059e+37  ;;  %vm970_vm9 = vweird.f32 %v933_v62 }
 0x200   :  { %v977_v28 = vor.u32 1.1754944e-38, %v976_v19  ;;  %vm975_vm11 = vcmp.eq.f32.partialorder %v974_v23, 8.507059e+37 }
 0x201   :  { %v1525_v1 = vpop.eup %1524  ;;  %v938_v2 = vmul.f32 %v1523_v60, %v937_v63 }
 0x202   :  { %v1527_v4 = vpop.eup %1526  ;;  %v934_v5 = vadd.f32 1.0, %v1525_v1 }
 0x203   :  { %v939_v6 = vadd.f32 %v1523_v60, %v938_v2  ;;  %v951_v7 = vmul.f32 %v1527_v4, %v932_v58  ;;  %vm956_vm4 = vweird.f32 %v1527_v4 }
 0x204   :  { %1530 = vrcp.f32 %v934_v5  ;;  %v1529_v9 = vpop.eup %1528  ;;  %vm957_vm6 = vmor %vm955_vm5, %vm956_vm4  ;;  %v991_v31 = vand.u32 2147483648, %v934_v5  ;;  %v989_v34 = vand.u32 2147483647, %v934_v5  ;;  %vm985_vm13 = vweird.f32 %v934_v5 }
 0x205   :  { %v943_v10 = vsel %vm942_vm2, %v1523_v60, %v939_v6  ;;  %v952_v11 = vsub.f32 1.0, %v951_v7  ;;  %v966_v14 = vmul.f32 %v1529_v9, %v933_v62  ;;  %vm971_vm7 = vweird.f32 %v1529_v9 }
 0x206   :  { %v948_v12 = vsel %vm945_vm3, %v947_v8, %v943_v10  ;;  %vm972_vm10 = vmor %vm970_vm9, %vm971_vm7  ;;  %v992_v36 = vor.u32 1.1754944e-38, %v991_v31  ;;  %vm990_vm15 = vcmp.eq.f32.partialorder %v989_v34, 8.507059e+37 }
 0x207   :  { %995 = vst [vmem:[#allocation13] sm:$0xff] %v948_v12  ;;  %v953_v15 = vmul.f32 %v1527_v4, %v952_v11  ;;  %v967_v17 = vsub.f32 1.0, %v966_v14 }
 0x209   :  { %v954_v18 = vadd.f32 %v1527_v4, %v953_v15  ;;  %v968_v22 = vmul.f32 %v1529_v9, %v967_v17 }
 0x20a   :  { %v1531_v20 = vpop.eup %1530 }
 0x20b   :  { %v958_v24 = vsel %vm957_vm6, %v1527_v4, %v954_v18  ;;  %v981_v25 = vmul.f32 %v1531_v20, %v934_v5  ;;  %v969_v27 = vadd.f32 %v1529_v9, %v968_v22  ;;  %vm986_vm12 = vweird.f32 %v1531_v20 }
 0x20c   :  { %v963_v26 = vsel %vm960_vm8, %v962_v21, %v958_v24  ;;  %vm987_vm14 = vmor %vm985_vm13, %vm986_vm12 }
 0x20d   :  { %996 = vst [vmem:[#allocation13 + $0x8] sm:$0xff] %v963_v26  ;;  %v982_v29 = vsub.f32 1.0, %v981_v25  ;;  %v973_v30 = vsel %vm972_vm10, %v1529_v9, %v969_v27 }
 0x20e   :  { %v978_v32 = vsel %vm975_vm11, %v977_v28, %v973_v30 }
 0x20f   :  { %v983_v33 = vmul.f32 %v1531_v20, %v982_v29  ;;  %997 = vst [vmem:[#allocation13 + $0x10] sm:$0xff] %v978_v32 }
 0x211   :  { %v984_v35 = vadd.f32 %v1531_v20, %v983_v33 }
 0x213   :  { %v988_v37 = vsel %vm987_vm14, %v1531_v20, %v984_v35 }
 0x214   :  { %v993_v38 = vsel %vm990_vm15, %v992_v36, %v988_v37 }
 0x215   :  { %998 = vst [vmem:[#allocation13 + $0x18] sm:$0xff] %v993_v38 }
 0x216   :  { %1011 = dma.vmem_to_hbm [thread:$0]  %s1004_s18, 512, %s1006_s21, [#allocation4], %s1719_s22, %s1719_s22, %s1720_s1  }
 0x217   :  { %1708 = dma.done.wait [#allocation4], 512  }
 0x218   :  { %1709 = vsyncadd [#allocation4], 4294966784 }
 0x219   :  { %1016 = vsyncpa [#allocation3], 1 }
 0x21a   :  { %1017 = vsyncpa [#allocation6], 1 }
 0x21b   :  { %1018 = vsyncpa [#allocation9], 1 }
 0x21c   :  { %1019 = vsyncpa [#allocation12], 1 }
 0x21d   :  { %1020 = vsyncpa [#allocation4], 1 }

</bundles_post_ra>
